<compile_context>
chip_gen: v7x
topology: tpu7x:2x2x1
jax: 0.10.0
libtpu: 0.0.40
codegen_flags: <defaults>
</compile_context>

<pallas_src>
import functools

import jax
import jax.numpy as jnp
from jax.experimental import pallas as pl
from jax.experimental.pallas import tpu as pltpu


def _round_up(x, m):
    return ((x + m - 1) // m) * m


def _pick_tile(dim, align, target):
    """Largest divisor of `dim` that is a multiple of `align` and <= target.

    All call sites guarantee `dim` is a multiple of `align`, so a valid tile
    (>= align) always exists and the full-dimension fallback can never blow
    the VMEM budget.
    """
    target = max(align, min(target, dim))
    if dim <= target:
        return dim
    best = align
    for t in range(align, target + 1, align):
        if dim % t == 0:
            best = t
    return best


def _tpu_config():
    """Generation-aware tile / VMEM budgets (v5e/v6e: 128 MiB VMEM, v7x: 64 MiB)."""
    cap = 64 << 20
    try:
        info = pltpu.get_tpu_info()
        cap = int(getattr(info, "vmem_capacity_bytes", cap) or cap)
    except Exception:
        pass
    if cap >= (96 << 20):
        # 128 MiB-VMEM parts: big streaming tiles, generous scoped limit.
        return dict(vmem_limit=96 << 20, tm=512, tn=1024, tk=1024,
                    ep_bytes=8 << 20)
    # 64 MiB-VMEM parts (v7x) or unknown: keep headroom for compiler scratch.
    return dict(vmem_limit=40 << 20, tm=256, tn=512, tk=512,
                ep_bytes=3 << 20)


# --------------------------------------------------------------------------
# Kernel 1: fused (im2col) matmul + conv-bias + per-M-tile channel sum-of-sq
# --------------------------------------------------------------------------
def _conv_matmul_stats_kernel(a_ref, w_ref, b_ref, y_ref, sq_ref, acc_ref):
    # grid = (M tiles [parallel], Cout tiles [parallel], K tiles [arbitrary])
    k = pl.program_id(2)

    @pl.when(k == 0)
    def _init():
        acc_ref[...] = jnp.zeros_like(acc_ref)

    # bf16 x bf16 -> f32 accumulation on the MXU.
    acc_ref[...] += jnp.dot(a_ref[...], w_ref[...],
                            preferred_element_type=jnp.float32)

    @pl.when(k == pl.num_programs(2) - 1)
    def _epilogue():
        acc = acc_ref[...] + b_ref[...]          # conv bias (f32 epilogue)
        y_ref[...] = acc.astype(y_ref.dtype)     # bf16 conv intermediate
        tm, tn = acc.shape
        # Per-channel sum of squares from the exact f32 accumulator, reduced
        # to 8 sublane-aligned partial rows (unmasked (8, tn) store; the tiny
        # final reduction happens in plain JAX).
        sq_ref[...] = jnp.sum(jnp.square(acc).reshape(tm // 8, 8, tn), axis=0)


def _conv_matmul_stats(a, w, bias_row, *, tm, tn, tk, vmem_limit):
    """a:(Mp,Kp) bf16, w:(Kp,Ncp) bf16, bias:(1,Ncp) f32
       -> conv (Mp,Ncp) bf16, partial channel sumsq (num_m_tiles*8, Ncp) f32."""
    m_pad, kp = a.shape
    _, ncp = w.shape
    gm, gn, gk = m_pad // tm, ncp // tn, kp // tk

    return pl.pallas_call(
        _conv_matmul_stats_kernel,
        out_shape=(
            jax.ShapeDtypeStruct((m_pad, ncp), jnp.bfloat16),
            jax.ShapeDtypeStruct((gm * 8, ncp), jnp.float32),
        ),
        grid=(gm, gn, gk),
        in_specs=[
            pl.BlockSpec((tm, tk), lambda i, j, k: (i, k)),
            pl.BlockSpec((tk, tn), lambda i, j, k: (k, j)),
            pl.BlockSpec((1, tn), lambda i, j, k: (0, j)),
        ],
        out_specs=(
            pl.BlockSpec((tm, tn), lambda i, j, k: (i, j)),
            pl.BlockSpec((8, tn), lambda i, j, k: (i, j)),
        ),
        scratch_shapes=[pltpu.VMEM((tm, tn), jnp.float32)],
        compiler_params=pltpu.CompilerParams(
            dimension_semantics=("parallel", "parallel", "arbitrary"),
            vmem_limit_bytes=vmem_limit,
        ),
    )(a, w, bias_row)


# --------------------------------------------------------------------------
# Kernel 2: per-channel scale/shift (batch-norm affine) + ReLU
# --------------------------------------------------------------------------
def _scale_shift_relu_kernel(y_ref, s_ref, b_ref, o_ref):
    y = y_ref[...].astype(jnp.float32) * s_ref[...] + b_ref[...]
    o_ref[...] = jnp.maximum(y, 0.0).astype(o_ref.dtype)


def _scale_shift_relu(y, scale_row, shift_row, *, cfg):
    m_pad, ncp = y.shape
    tn = _pick_tile(ncp, 128, cfg["tn"])
    # bf16 in (2B) + f32 out (4B) per element per tile row, roughly.
    tm = _pick_tile(m_pad, 16, max(16, cfg["ep_bytes"] // (tn * 6)))
    grid = (m_pad // tm, ncp // tn)
    return pl.pallas_call(
        _scale_shift_relu_kernel,
        out_shape=jax.ShapeDtypeStruct((m_pad, ncp), jnp.float32),
        grid=grid,
        in_specs=[
            pl.BlockSpec((tm, tn), lambda i, j: (i, j)),
            pl.BlockSpec((1, tn), lambda i, j: (0, j)),
            pl.BlockSpec((1, tn), lambda i, j: (0, j)),
        ],
        out_specs=pl.BlockSpec((tm, tn), lambda i, j: (i, j)),
        compiler_params=pltpu.CompilerParams(
            dimension_semantics=("parallel", "parallel"),
            vmem_limit_bytes=cfg["vmem_limit"],
        ),
    )(y, scale_row, shift_row)


# --------------------------------------------------------------------------
# JAX glue: im2col, parameter layout, full forward
# --------------------------------------------------------------------------
def _im2col(x_nhwc, kh, kw, stride, padding):
    """x:(N,H,W,Cin) -> patches (N*Ho*Wo, kh*kw*Cin), plus output geometry."""
    n = x_nhwc.shape[0]
    x = x_nhwc
    if padding:
        x = jnp.pad(x, ((0, 0), (padding, padding), (padding, padding), (0, 0)))
    hp, wp, cin = x.shape[1], x.shape[2], x.shape[3]
    ho = (hp - kh) // stride + 1
    wo = (wp - kw) // stride + 1
    cols = []
    for dh in range(kh):
        for dw in range(kw):
            cols.append(
                x[:, dh:dh + stride * (ho - 1) + 1:stride,
                  dw:dw + stride * (wo - 1) + 1:stride, :])
    patches = jnp.concatenate(cols, axis=-1)          # (N, Ho, Wo, kh*kw*Cin)
    return patches.reshape(n * ho * wo, kh * kw * cin), n, ho, wo


def conv_bn_relu(x_nchw, params, *, stride, padding, eps=1e-5, training=True):
    """Forward of Batchnorm_std: Conv2d(+bias) -> BatchNorm2d -> ReLU."""
    w = params["w"]                     # torch layout (Cout, Cin, kh, kw)
    b = params["b"]                     # (Cout,)
    gamma, beta = params["gamma"], params["beta"]
    cout, cin, kh, kw = w.shape

    cfg = _tpu_config()

    # NCHW -> NHWC; cast to bf16 *before* im2col so the kh*kw-inflated patches
    # intermediate is written to / read from HBM at half width.
    x = jnp.transpose(x_nchw, (0, 2, 3, 1)).astype(jnp.bfloat16)
    patches, n, ho, wo = _im2col(x, kh, kw, stride, padding)
    m, k = patches.shape

    # Pad K / Cout to 128 multiples (lane-dense, full MXU lanes); pad M to a
    # multiple of the fixed M tile (predictable tiling; corrected in stats).
    kp = _round_up(k, 128)
    ncp = _round_up(cout, 128)
    tm = min(cfg["tm"], _round_up(m, 16))
    m_pad = _round_up(m, tm)
    tn = _pick_tile(ncp, 128, cfg["tn"])
    tk = _pick_tile(kp, 128, cfg["tk"])

    a = jnp.pad(patches, ((0, m_pad - m), (0, kp - k)))             # bf16
    w_mat_f32 = jnp.pad(
        jnp.transpose(w, (2, 3, 1, 0)).reshape(k, cout).astype(jnp.float32),
        ((0, kp - k), (0, ncp - cout)))
    w_bf16 = w_mat_f32.astype(jnp.bfloat16)
    bias_row = jnp.pad(b, (0, ncp - cout)).reshape(1, ncp).astype(jnp.float32)

    # Pass 1: bf16 MXU conv matmul + bias + per-M-tile channel sum-of-squares.
    y, psq = _conv_matmul_stats(a, w_bf16, bias_row, tm=tm, tn=tn, tk=tk,
                                vmem_limit=cfg["vmem_limit"])

    if training:
        # Channel sums analytically: sum_c = colsum(patches) @ W + M * bias
        # (zero-padded rows/cols contribute nothing; removes one VPU op per
        # output element from the kernel-1 epilogue).
        col_sum = jnp.sum(a, axis=0, dtype=jnp.float32)             # (kp,)
        csum = jnp.dot(col_sum, w_mat_f32) + float(m) * bias_row[0]  # (ncp,)
        # Padded rows of the accumulator equal the bias exactly; subtract.
        csq = jnp.sum(psq, axis=0) - float(m_pad - m) * jnp.square(bias_row[0])
        count = float(m)
        mean = csum / count
        # TODO(synk): E[x^2]-E[x]^2 can cancel if |mean| >> std; a shifted
        # two-pass estimate would be needed for tighter BN accuracy.
        var = jnp.maximum(csq / count - mean * mean, 0.0)
    else:
        mean = jnp.pad(params["running_mean"], (0, ncp - cout))
        var = jnp.pad(params["running_var"], (0, ncp - cout), constant_values=1.0)

    gamma_p = jnp.pad(gamma, (0, ncp - cout))
    beta_p = jnp.pad(beta, (0, ncp - cout))
    scale = gamma_p * jax.lax.rsqrt(var + eps)
    shift = beta_p - mean * scale

    # Pass 2: normalize + affine + ReLU (bf16 in, f32 compute / output).
    out = _scale_shift_relu(
        y,
        scale.reshape(1, ncp).astype(jnp.float32),
        shift.reshape(1, ncp).astype(jnp.float32),
        cfg=cfg,
    )
    out = out[:m].reshape(n, ho, wo, ncp)[:, :, :, :cout]
    return jnp.transpose(out, (0, 3, 1, 2))            # back to NCHW


def init_params(key, in_channels, out_channels, kernel_size):
    k1, k2, k3, k4 = jax.random.split(key, 4)
    fan_in = in_channels * kernel_size * kernel_size
    w = jax.random.normal(
        k1, (out_channels, in_channels, kernel_size, kernel_size),
        jnp.float32) * (2.0 / fan_in) ** 0.5
    b = jax.random.normal(k2, (out_channels,), jnp.float32) * 0.01
    gamma = 1.0 + 0.1 * jax.random.normal(k3, (out_channels,), jnp.float32)
    beta = 0.1 * jax.random.normal(k4, (out_channels,), jnp.float32)
    return dict(
        w=w, b=b, gamma=gamma, beta=beta,
        running_mean=jnp.zeros((out_channels,), jnp.float32),
        running_var=jnp.ones((out_channels,), jnp.float32),
    )


def _reference(x, params, stride, padding, eps=1e-5):
    """Pure-JAX f32 reference of the PyTorch forward (train-mode BN)."""
    y = jax.lax.conv_general_dilated(
        x, params["w"], window_strides=(stride, stride),
        padding=[(padding, padding), (padding, padding)],
        dimension_numbers=("NCHW", "OIHW", "NCHW"))
    y = y + params["b"].reshape(1, -1, 1, 1)
    mean = jnp.mean(y, axis=(0, 2, 3), keepdims=True)
    var = jnp.mean((y - mean) ** 2, axis=(0, 2, 3), keepdims=True)
    y = (y - mean) * jax.lax.rsqrt(var + eps)
    y = y * params["gamma"].reshape(1, -1, 1, 1) + params["beta"].reshape(1, -1, 1, 1)
    return jnp.maximum(y, 0.0)


if __name__ == "__main__":
    key = jax.random.PRNGKey(0)
    kx, kp = jax.random.split(key)

    batch, in_channels, out_channels, size = 2, 4, 32, 16
    kernel_size, stride, padding = 3, 2, 1

    x = jax.random.normal(kx, (batch, in_channels, size, size), jnp.float32)
    params = init_params(kp, in_channels, out_channels, kernel_size)

    fwd = jax.jit(functools.partial(conv_bn_relu, stride=stride, padding=padding))
    out = fwd(x, params)
    jax.block_until_ready(out)

    assert out.shape == (batch, out_channels, size // stride, size // stride)
    assert bool(jnp.all(jnp.isfinite(out)))

    ref = _reference(x, params, stride, padding)
    err = float(jnp.max(jnp.abs(out - ref)))
    assert bool(jnp.allclose(out, ref, atol=5e-2, rtol=5e-2)), f"max abs err {err}"

    print("KERNEL_OK")
</pallas_src>

<mosaic_0001>
module attributes {stable_mosaic.version = 11 : i64} {
  func.func @_conv_matmul_stats_kernel(%arg0: i32, %arg1: i32, %arg2: i32, %arg3: memref<128x128xbf16, #tpu.memory_space<vmem>>, %arg4: memref<128x128xbf16, #tpu.memory_space<vmem>>, %arg5: memref<1x128xf32, #tpu.memory_space<vmem>>, %arg6: memref<128x128xbf16, #tpu.memory_space<vmem>>, %arg7: memref<8x128xf32, #tpu.memory_space<vmem>>, %arg8: memref<128x128xf32, #tpu.memory_space<vmem>>) attributes {dimension_semantics = [#tpu.dimension_semantics<parallel>, #tpu.dimension_semantics<parallel>, #tpu.dimension_semantics<arbitrary>], iteration_bounds = array<i64: 1, 1, 1>, scalar_prefetch = 0 : i64, scratch_operands = 1 : i64, tpu.core_type = #tpu.core_type<tc>, window_params = [{transform_indices = @transform_0, window_bounds = array<i64: 128, 128>}, {transform_indices = @transform_1, window_bounds = array<i64: 128, 128>}, {transform_indices = @transform_2, window_bounds = array<i64: 1, 128>}, {transform_indices = @transform_3, window_bounds = array<i64: 128, 128>}, {transform_indices = @transform_4, window_bounds = array<i64: 8, 128>}]} {
    %c0_i32 = arith.constant 0 : i32
    %0 = arith.cmpi eq, %arg2, %c0_i32 : i32
    %1 = arith.extui %0 : i1 to i32
    %c0_i32_0 = arith.constant 0 : i32
    %2 = arith.cmpi ne, %1, %c0_i32_0 : i32
    scf.if %2 {
      %cst_10 = arith.constant 0.000000e+00 : f32
      %12 = vector.broadcast %cst_10 : f32 to vector<128x128xf32>
      %c0_11 = arith.constant 0 : index
      %c0_12 = arith.constant 0 : index
      %13 = vector.load %arg8[%c0_11, %c0_12] : memref<128x128xf32, #tpu.memory_space<vmem>>, vector<128x128xf32>
      tpu.vector_store %arg8[%c0_11, %c0_12], %12 {strides = array<i32>} : memref<128x128xf32, #tpu.memory_space<vmem>>, vector<128x128xf32>,
    } else {
    }
    %c0 = arith.constant 0 : index
    %c0_1 = arith.constant 0 : index
    %3 = vector.load %arg8[%c0, %c0_1] : memref<128x128xf32, #tpu.memory_space<vmem>>, vector<128x128xf32>
    %c0_2 = arith.constant 0 : index
    %c0_3 = arith.constant 0 : index
    %4 = vector.load %arg3[%c0_2, %c0_3] : memref<128x128xbf16, #tpu.memory_space<vmem>>, vector<128x128xbf16>
    %c0_4 = arith.constant 0 : index
    %c0_5 = arith.constant 0 : index
    %5 = vector.load %arg4[%c0_4, %c0_5] : memref<128x128xbf16, #tpu.memory_space<vmem>>, vector<128x128xbf16>
    %cst = arith.constant dense<0.000000e+00> : vector<128x128xf32>
    %6 = tpu.matmul %4, %5, %cst {dimension_numbers = #tpu.dot_dimension_numbers<[1], [0], [0], [1], [0, 0, 1, 1], [], []>} : vector<128x128xbf16>, vector<128x128xbf16>, vector<128x128xf32> -> vector<128x128xf32>
    %7 = arith.addf %3, %6 : vector<128x128xf32>
    %c0_6 = arith.constant 0 : index
    %c0_7 = arith.constant 0 : index
    %8 = vector.load %arg8[%c0_6, %c0_7] : memref<128x128xf32, #tpu.memory_space<vmem>>, vector<128x128xf32>
    tpu.vector_store %arg8[%c0_6, %c0_7], %7 {strides = array<i32>} : memref<128x128xf32, #tpu.memory_space<vmem>>, vector<128x128xf32>,
    %c0_i32_8 = arith.constant 0 : i32
    %9 = arith.cmpi eq, %arg2, %c0_i32_8 : i32
    %10 = arith.extui %9 : i1 to i32
    %c0_i32_9 = arith.constant 0 : i32
    %11 = arith.cmpi ne, %10, %c0_i32_9 : i32
    scf.if %11 {
      %c0_10 = arith.constant 0 : index
      %c0_11 = arith.constant 0 : index
      %12 = vector.load %arg8[%c0_10, %c0_11] : memref<128x128xf32, #tpu.memory_space<vmem>>, vector<128x128xf32>
      %c0_12 = arith.constant 0 : index
      %c0_13 = arith.constant 0 : index
      %13 = vector.load %arg5[%c0_12, %c0_13] : memref<1x128xf32, #tpu.memory_space<vmem>>, vector<1x128xf32>
      %14 = vector.broadcast %13 : vector<1x128xf32> to vector<128x128xf32>
      %15 = arith.addf %12, %14 : vector<128x128xf32>
      %16 = arith.truncf %15 : vector<128x128xf32> to vector<128x128xbf16>
      %c0_14 = arith.constant 0 : index
      %c0_15 = arith.constant 0 : index
      %17 = vector.load %arg6[%c0_14, %c0_15] : memref<128x128xbf16, #tpu.memory_space<vmem>>, vector<128x128xbf16>
      tpu.vector_store %arg6[%c0_14, %c0_15], %16 {strides = array<i32>} : memref<128x128xbf16, #tpu.memory_space<vmem>>, vector<128x128xbf16>,
      %18 = arith.mulf %15, %15 : vector<128x128xf32>
      %19 = vector.shape_cast %18 : vector<128x128xf32> to vector<16x8x128xf32>
      %cst_16 = arith.constant dense<0.000000e+00> : vector<8x128xf32>
      %20 = vector.multi_reduction <add>, %19, %cst_16 [0] : vector<16x8x128xf32> to vector<8x128xf32>
      %c0_17 = arith.constant 0 : index
      %c0_18 = arith.constant 0 : index
      %21 = vector.load %arg7[%c0_17, %c0_18] : memref<8x128xf32, #tpu.memory_space<vmem>>, vector<8x128xf32>
      tpu.vector_store %arg7[%c0_17, %c0_18], %20 {strides = array<i32>} : memref<8x128xf32, #tpu.memory_space<vmem>>, vector<8x128xf32>,
    } else {
    }
    return
  }
  func.func @transform_0(%arg0: i32, %arg1: i32, %arg2: i32) -> (i32, i32) {
    %c0_i32 = arith.constant 0 : i32
    return %arg0, %arg2 : i32, i32
  }
  func.func @transform_1(%arg0: i32, %arg1: i32, %arg2: i32) -> (i32, i32) {
    %c0_i32 = arith.constant 0 : i32
    return %arg2, %arg1 : i32, i32
  }
  func.func @transform_2(%arg0: i32, %arg1: i32, %arg2: i32) -> (i32, i32) {
    %c0_i32 = arith.constant 0 : i32
    %c0_i32_0 = arith.constant 0 : i32
    return %c0_i32, %arg1 : i32, i32
  }
  func.func @transform_3(%arg0: i32, %arg1: i32, %arg2: i32) -> (i32, i32) {
    %c0_i32 = arith.constant 0 : i32
    return %arg0, %arg1 : i32, i32
  }
  func.func @transform_4(%arg0: i32, %arg1: i32, %arg2: i32) -> (i32, i32) {
    %c0_i32 = arith.constant 0 : i32
    return %arg0, %arg1 : i32, i32
  }
}

module attributes {stable_mosaic.version = 11 : i64} {
  func.func @_scale_shift_relu_kernel(%arg0: i32, %arg1: i32, %arg2: memref<128x128xbf16, #tpu.memory_space<vmem>>, %arg3: memref<1x128xf32, #tpu.memory_space<vmem>>, %arg4: memref<1x128xf32, #tpu.memory_space<vmem>>, %arg5: memref<128x128xf32, #tpu.memory_space<vmem>>) attributes {dimension_semantics = [#tpu.dimension_semantics<parallel>, #tpu.dimension_semantics<parallel>], iteration_bounds = array<i64: 1, 1>, scalar_prefetch = 0 : i64, scratch_operands = 0 : i64, tpu.core_type = #tpu.core_type<tc>, window_params = [{transform_indices = @transform_0, window_bounds = array<i64: 128, 128>}, {transform_indices = @transform_1, window_bounds = array<i64: 1, 128>}, {transform_indices = @transform_2, window_bounds = array<i64: 1, 128>}, {transform_indices = @transform_3, window_bounds = array<i64: 128, 128>}]} {
    %c0 = arith.constant 0 : index
    %c0_0 = arith.constant 0 : index
    %0 = vector.load %arg2[%c0, %c0_0] : memref<128x128xbf16, #tpu.memory_space<vmem>>, vector<128x128xbf16>
    %1 = arith.extf %0 : vector<128x128xbf16> to vector<128x128xf32>
    %c0_1 = arith.constant 0 : index
    %c0_2 = arith.constant 0 : index
    %2 = vector.load %arg3[%c0_1, %c0_2] : memref<1x128xf32, #tpu.memory_space<vmem>>, vector<1x128xf32>
    %3 = vector.broadcast %2 : vector<1x128xf32> to vector<128x128xf32>
    %4 = arith.mulf %1, %3 : vector<128x128xf32>
    %c0_3 = arith.constant 0 : index
    %c0_4 = arith.constant 0 : index
    %5 = vector.load %arg4[%c0_3, %c0_4] : memref<1x128xf32, #tpu.memory_space<vmem>>, vector<1x128xf32>
    %6 = vector.broadcast %5 : vector<1x128xf32> to vector<128x128xf32>
    %7 = arith.addf %4, %6 : vector<128x128xf32>
    %cst = arith.constant 0.000000e+00 : f32
    %8 = vector.broadcast %cst : f32 to vector<128x128xf32>
    %9 = arith.maximumf %7, %8 : vector<128x128xf32>
    %c0_5 = arith.constant 0 : index
    %c0_6 = arith.constant 0 : index
    %10 = vector.load %arg5[%c0_5, %c0_6] : memref<128x128xf32, #tpu.memory_space<vmem>>, vector<128x128xf32>
    tpu.vector_store %arg5[%c0_5, %c0_6], %9 {strides = array<i32>} : memref<128x128xf32, #tpu.memory_space<vmem>>, vector<128x128xf32>,
    return
  }
  func.func @transform_0(%arg0: i32, %arg1: i32) -> (i32, i32) {
    %c0_i32 = arith.constant 0 : i32
    return %arg0, %arg1 : i32, i32
  }
  func.func @transform_1(%arg0: i32, %arg1: i32) -> (i32, i32) {
    %c0_i32 = arith.constant 0 : i32
    %c0_i32_0 = arith.constant 0 : i32
    return %c0_i32, %arg1 : i32, i32
  }
  func.func @transform_2(%arg0: i32, %arg1: i32) -> (i32, i32) {
    %c0_i32 = arith.constant 0 : i32
    %c0_i32_0 = arith.constant 0 : i32
    return %c0_i32, %arg1 : i32, i32
  }
  func.func @transform_3(%arg0: i32, %arg1: i32) -> (i32, i32) {
    %c0_i32 = arith.constant 0 : i32
    return %arg0, %arg1 : i32, i32
  }
}

</mosaic_0001>

<bundles_post_ra>
// kernel: conv_bn_relu.3
= control target key start
LH: loop header
LB: loop body
LE: loop exit
PB: predicated region body
PF: predicated region fallthrough
CT: control target
= control target key end

     0   :  { %s303_s0 = inlined_call_operand.vmem [shape: bf16[128,128], index: 0, kind: input, shape index: {}]   ;;  %s304_s1 = inlined_call_operand.vmem [shape: f32[1,128], index: 1, kind: input, shape index: {}]   ;;  %s305_s2 = inlined_call_operand.vmem [shape: f32[1,128], index: 2, kind: input, shape index: {}]   ;;  %s306_s3 = inlined_call_operand.vmem [shape: f32[128,128], index: 3, kind: output, shape index: {}]  }
   0x1   :  { %v131_v0 = vld [vmem:[%s303_s0] sm:$0xff]   ;;  %v162_v4 = vld [vmem:[%s303_s0 + $0x8] sm:$0xff]   ;;  %v163_v5 = vld [vmem:[%s303_s0 + $0x10] sm:$0xff]  }
   0x2   :  { %v195_v1 = vld [vmem:[%s304_s1] ss:$0 sm:$0xff]  ;;  %v132_v2 = vunpack.c.l.bf16 %v131_v0  ;;  %v133_v3 = vunpack.c.h.bf16 %v131_v0  ;;  %v164_v6 = vld [vmem:[%s303_s0 + $0x18] sm:$0xff]   ;;  %v136_v8 = vunpack.c.l.bf16 %v162_v4  ;;  %v137_v9 = vunpack.c.h.bf16 %v162_v4  ;;  %v166_v33 = vld [vmem:[%s303_s0 + $0x28] sm:$0xff]  }
   0x3   :  { %v209_v7 = vld [vmem:[%s305_s2] ss:$0 sm:$0xff]  ;;  %v140_v10 = vunpack.c.l.bf16 %v163_v5  ;;  %v141_v11 = vunpack.c.h.bf16 %v163_v5  ;;  %v144_v14 = vunpack.c.l.bf16 %v164_v6  ;;  %v145_v15 = vunpack.c.h.bf16 %v164_v6  ;;  %v167_v34 = vld [vmem:[%s303_s0 + $0x30] sm:$0xff]   ;;  %v168_v39 = vld [vmem:[%s303_s0 + $0x38] sm:$0xff]  }
   0x4   :  { %v53_v12 = vmul.f32 %v132_v2, %v195_v1  ;;  %v54_v13 = vmul.f32 %v133_v3, %v195_v1  ;;  %v55_v16 = vmul.f32 %v136_v8, %v195_v1  ;;  %v56_v17 = vmul.f32 %v137_v9, %v195_v1  ;;  %v165_v28 = vld [vmem:[%s303_s0 + $0x20] sm:$0xff]  }
   0x5   :  { %v57_v18 = vmul.f32 %v140_v10, %v195_v1  ;;  %v58_v19 = vmul.f32 %v141_v11, %v195_v1  ;;  %v59_v22 = vmul.f32 %v144_v14, %v195_v1  ;;  %v60_v23 = vmul.f32 %v145_v15, %v195_v1 }
   0x6   :  { %v76_v20 = vadd.f32 %v209_v7, %v53_v12  ;;  %v77_v21 = vadd.f32 %v209_v7, %v54_v13  ;;  %v78_v24 = vadd.f32 %v209_v7, %v55_v16  ;;  %v79_v25 = vadd.f32 %v209_v7, %v56_v17 }
   0x7   :  { %v80_v26 = vadd.f32 %v209_v7, %v57_v18  ;;  %v81_v27 = vadd.f32 %v209_v7, %v58_v19  ;;  %v82_v31 = vadd.f32 %v209_v7, %v59_v22  ;;  %v83_v32 = vadd.f32 %v209_v7, %v60_v23 }
   0x8   :  { %v92_v29 = vmax.f32 %v76_v20, 0.0  ;;  %v93_v30 = vmax.f32 %v77_v21, 0.0  ;;  %v94_v35 = vmax.f32 %v78_v24, 0.0  ;;  %v95_v36 = vmax.f32 %v79_v25, 0.0 }
   0x9   :  { %v96_v37 = vmax.f32 %v80_v26, 0.0  ;;  %v97_v38 = vmax.f32 %v81_v27, 0.0  ;;  %v98_v40 = vmax.f32 %v82_v31, 0.0  ;;  %v99_v41 = vmax.f32 %v83_v32, 0.0 }
   0xa   :  { %108 = vst [vmem:[%s306_s3] sm:$0xff] %v92_v29  ;;  %109 = vst [vmem:[%s306_s3 + $0x8] sm:$0xff] %v93_v30  ;;  %v148_v42 = vunpack.c.l.bf16 %v165_v28  ;;  %v149_v43 = vunpack.c.h.bf16 %v165_v28  ;;  %v152_v44 = vunpack.c.l.bf16 %v166_v33  ;;  %v153_v45 = vunpack.c.h.bf16 %v166_v33 }
   0xb   :  { %110 = vst [vmem:[%s306_s3 + $0x10] sm:$0xff] %v94_v35  ;;  %111 = vst [vmem:[%s306_s3 + $0x18] sm:$0xff] %v95_v36  ;;  %v156_v46 = vunpack.c.l.bf16 %v167_v34  ;;  %v157_v47 = vunpack.c.h.bf16 %v167_v34  ;;  %v160_v50 = vunpack.c.l.bf16 %v168_v39  ;;  %v161_v51 = vunpack.c.h.bf16 %v168_v39 }
   0xc   :  { %112 = vst [vmem:[%s306_s3 + $0x20] sm:$0xff] %v96_v37  ;;  %113 = vst [vmem:[%s306_s3 + $0x28] sm:$0xff] %v97_v38  ;;  %v61_v48 = vmul.f32 %v148_v42, %v195_v1  ;;  %v62_v49 = vmul.f32 %v149_v43, %v195_v1  ;;  %v63_v52 = vmul.f32 %v152_v44, %v195_v1 }
   0xd   :  { %114 = vst [vmem:[%s306_s3 + $0x30] sm:$0xff] %v98_v40  ;;  %115 = vst [vmem:[%s306_s3 + $0x38] sm:$0xff] %v99_v41  ;;  %v64_v53 = vmul.f32 %v153_v45, %v195_v1  ;;  %v65_v54 = vmul.f32 %v156_v46, %v195_v1  ;;  %v66_v55 = vmul.f32 %v157_v47, %v195_v1 }
   0xe   :  { %v84_v56 = vadd.f32 %v209_v7, %v61_v48  ;;  %v85_v57 = vadd.f32 %v209_v7, %v62_v49  ;;  %v67_v58 = vmul.f32 %v160_v50, %v195_v1  ;;  %v68_v59 = vmul.f32 %v161_v51, %v195_v1 }
   0xf   :  { %v86_v60 = vadd.f32 %v209_v7, %v63_v52  ;;  %v87_v61 = vadd.f32 %v209_v7, %v64_v53  ;;  %v88_v62 = vadd.f32 %v209_v7, %v65_v54  ;;  %v89_v63 = vadd.f32 %v209_v7, %v66_v55 }
  0x10   :  { %v100_v0 = vmax.f32 %v84_v56, 0.0  ;;  %v101_v2 = vmax.f32 %v85_v57, 0.0  ;;  %v90_v3 = vadd.f32 %v209_v7, %v67_v58  ;;  %v91_v4 = vadd.f32 %v209_v7, %v68_v59 }
  0x11   :  { %v102_v5 = vmax.f32 %v86_v60, 0.0  ;;  %v103_v6 = vmax.f32 %v87_v61, 0.0  ;;  %v104_v8 = vmax.f32 %v88_v62, 0.0  ;;  %v105_v9 = vmax.f32 %v89_v63, 0.0 }
  0x12   :  { %116 = vst [vmem:[%s306_s3 + $0x40] sm:$0xff] %v100_v0  ;;  %117 = vst [vmem:[%s306_s3 + $0x48] sm:$0xff] %v101_v2  ;;  %v106_v1 = vmax.f32 %v90_v3, 0.0  ;;  %v107_v10 = vmax.f32 %v91_v4, 0.0 }
  0x13   :  { %118 = vst [vmem:[%s306_s3 + $0x50] sm:$0xff] %v102_v5  ;;  %119 = vst [vmem:[%s306_s3 + $0x58] sm:$0xff] %v103_v6 }
  0x14   :  { %120 = vst [vmem:[%s306_s3 + $0x60] sm:$0xff] %v104_v8  ;;  %121 = vst [vmem:[%s306_s3 + $0x68] sm:$0xff] %v105_v9 }
  0x15   :  { %122 = vst [vmem:[%s306_s3 + $0x70] sm:$0xff] %v106_v1  ;;  %123 = vst [vmem:[%s306_s3 + $0x78] sm:$0xff] %v107_v10 }

// kernel: conv_bn_relu.2
= control target key start
LH: loop header
LB: loop body
LE: loop exit
PB: predicated region body
PF: predicated region fallthrough
CT: control target
= control target key end

     0   :  { %s756_s1 = inlined_call_operand.vmem [shape: bf16[128,128], index: 1, kind: input, shape index: {}]   ;;  %s757_s0 = inlined_call_operand.vmem [shape: bf16[128,128], index: 0, kind: input, shape index: {}]   ;;  %s758_s2 = inlined_call_operand.vmem [shape: f32[1,128], index: 2, kind: input, shape index: {}]   ;;  %s759_s3 = inlined_call_operand.vmem [shape: bf16[128,128], index: 3, kind: output, shape index: {0}]   ;;  %s760_s4 = inlined_call_operand.vmem [shape: f32[8,128], index: 4, kind: output, shape index: {1}]  }
   0x1   :  { %v632_v0 = vld [vmem:[%s756_s1] sm:$0xff]   ;;  %v633_v1 = vld [vmem:[%s756_s1 + $0x8] sm:$0xff]   ;;  %v634_v2 = vld [vmem:[%s756_s1 + $0x10] sm:$0xff]  }
   0x2   :  { %584 = vmatprep.subr.bf16.mxu0 %v632_v0  ;;  %616 = vmatprep.subr.bf16.mxu1 %v632_v0  ;;  %v635_v3 = vld [vmem:[%s756_s1 + $0x18] sm:$0xff]   ;;  %v640_v4 = vld [vmem:[%s757_s0] sm:$0xff]   ;;  %v637_v7 = vld [vmem:[%s756_s1 + $0x28] sm:$0xff]  }
   0x3   :  { %585 = vmatpush3.bf16.msra.mxu0 %v632_v0  ;;  %624 = vmatpush3.bf16.msra.mxu1 %v632_v0  ;;  %v636_v5 = vld [vmem:[%s756_s1 + $0x20] sm:$0xff]   ;;  %v638_v8 = vld [vmem:[%s756_s1 + $0x30] sm:$0xff]   ;;  %v639_v9 = vld [vmem:[%s756_s1 + $0x38] sm:$0xff]  }
   0x4   :  { %586 = vmatprep.subr.bf16.mxu0 %v633_v1  ;;  %617 = vmatprep.subr.bf16.mxu1 %v633_v1  ;;  %v644_v6 = vld [vmem:[%s757_s0 + $0x20] sm:$0xff]   ;;  %v641_v10 = vld [vmem:[%s757_s0 + $0x8] sm:$0xff]   ;;  %v642_v12 = vld [vmem:[%s757_s0 + $0x10] sm:$0xff]  }
   0x5   :  { %600 = vmatprep.mubr.bf16.mxu0 %v640_v4  ;;  %608 = vmatprep.mubr.bf16.mxu1 %v644_v6  ;;  %v645_v11 = vld [vmem:[%s757_s0 + $0x28] sm:$0xff]   ;;  %v646_v13 = vld [vmem:[%s757_s0 + $0x30] sm:$0xff]   ;;  %v643_v14 = vld [vmem:[%s757_s0 + $0x18] sm:$0xff]  }
   0x6   :  { %v647_v15 = vld [vmem:[%s757_s0 + $0x38] sm:$0xff]   ;;  %v488_v16 = vld [vmem:[%s758_s2] ss:$0 sm:$0xff] }
   0x7   :  { %587 = vmatpush3.bf16.msra.mxu0 %v633_v1  ;;  %625 = vmatpush3.bf16.msra.mxu1 %v633_v1 }
   0x8   :  { %588 = vmatprep.subr.bf16.mxu0 %v634_v2  ;;  %618 = vmatprep.subr.bf16.mxu1 %v634_v2 }
   0xb   :  { %589 = vmatpush3.bf16.msra.mxu0 %v634_v2  ;;  %626 = vmatpush3.bf16.msra.mxu1 %v634_v2 }
   0xc   :  { %590 = vmatprep.subr.bf16.mxu0 %v635_v3  ;;  %619 = vmatprep.subr.bf16.mxu1 %v635_v3 }
   0xf   :  { %591 = vmatpush3.bf16.msra.mxu0 %v635_v3  ;;  %627 = vmatpush3.bf16.msra.mxu1 %v635_v3 }
  0x10   :  { %592 = vmatprep.subr.bf16.mxu0 %v636_v5  ;;  %620 = vmatprep.subr.bf16.mxu1 %v636_v5 }
  0x13   :  { %593 = vmatpush3.bf16.msra.mxu0 %v636_v5  ;;  %628 = vmatpush3.bf16.msra.mxu1 %v636_v5 }
  0x14   :  { %594 = vmatprep.subr.bf16.mxu0 %v637_v7  ;;  %621 = vmatprep.subr.bf16.mxu1 %v637_v7 }
  0x17   :  { %595 = vmatpush3.bf16.msra.mxu0 %v637_v7  ;;  %629 = vmatpush3.bf16.msra.mxu1 %v637_v7 }
  0x18   :  { %596 = vmatprep.subr.bf16.mxu0 %v638_v8  ;;  %622 = vmatprep.subr.bf16.mxu1 %v638_v8 }
  0x1b   :  { %597 = vmatpush3.bf16.msra.mxu0 %v638_v8  ;;  %630 = vmatpush3.bf16.msra.mxu1 %v638_v8 }
  0x1c   :  { %598 = vmatprep.subr.bf16.mxu0 %v639_v9  ;;  %623 = vmatprep.subr.bf16.mxu1 %v639_v9 }
  0x1f   :  { %599 = vmatpush3.bf16.msra.mxu0 %v639_v9  ;;  %631 = vmatpush3.bf16.msra.mxu1 %v639_v9 }
  0x22   :  { %601 = vmatmul.mubr.bf16.vlgmr.msra.gmra.mrb[0].mxu0 %v641_v10  ;;  %609 = vmatmul.mubr.bf16.vlgmr.msra.gmra.mrb[0].mxu1 %v645_v11 }
  0x23   :  { %604 = vmatprep.mubr.bf16.mxu0 %v642_v12  ;;  %612 = vmatprep.mubr.bf16.mxu1 %v646_v13 }
  0x2a   :  { %605 = vmatmul.mubr.bf16.gmra.mrb[4].mxu0 %v643_v14  ;;  %613 = vmatmul.mubr.bf16.gmra.mrb[4].mxu1 %v647_v15 }
  0xf5   :  { %v602_v17 = vpop.f32.mrb[0].mxu0  ;;  %v610_v18 = vpop.f32.mrb[0].mxu1 }
  0xf6   :  { %v215_v19 = vpop.f32.mrb[1].mxu0  ;;  %v724_v20 = vadd.f32 %v610_v18, %v488_v16  ;;  %v247_v21 = vpop.f32.mrb[1].mxu1  ;;  %v338_v26 = vadd.f32 %v602_v17, %v488_v16 }
  0xf7   :  { %v336_v22 = vadd.f32 %v488_v16, %v215_v19  ;;  %v603_v23 = vpop.f32.mrb[2].mxu0  ;;  %v344_v24 = vadd.f32 %v488_v16, %v247_v21  ;;  %v611_v25 = vpop.f32.mrb[2].mxu1 }
  0xf8   :  { %v339_v27 = vadd.f32 %v603_v23, %v488_v16  ;;  %v218_v28 = vpop.f32.mrb[3].mxu0  ;;  %v347_v29 = vadd.f32 %v611_v25, %v488_v16  ;;  %v250_v30 = vpop.f32.mrb[3].mxu1  ;;  %v434_v39 = vmul.f32 %v338_v26, %v338_v26  ;;  %v442_v11 = vmul.f32 %v724_v20, %v724_v20 }
  0xf9   :  { %v337_v31 = vadd.f32 %v488_v16, %v218_v28  ;;  %v345_v32 = vadd.f32 %v488_v16, %v250_v30  ;;  %v432_v35 = vmul.f32 %v336_v22, %v336_v22  ;;  %v440_v7 = vmul.f32 %v344_v24, %v344_v24 }
  0xfa   :  { %v529_v33 = vpack.c.bf16 %v339_v27, %v338_v26  ;;  %v549_v34 = vpack.c.bf16 %v347_v29, %v724_v20  ;;  %v435_v46 = vmul.f32 %v339_v27, %v339_v27  ;;  %v443_v13 = vmul.f32 %v347_v29, %v347_v29 }
  0xfb   :  { %v524_v36 = vpack.c.bf16 %v337_v31, %v336_v22  ;;  %v433_v37 = vmul.f32 %v337_v31, %v337_v31  ;;  %v544_v38 = vpack.c.bf16 %v345_v32, %v344_v24  ;;  %v441_v10 = vmul.f32 %v345_v32, %v345_v32 }
  0xfc   :  { %561 = vst [vmem:[%s759_s3 + $0x8] sm:$0xff] %v529_v33   ;;  %565 = vst [vmem:[%s759_s3 + $0x28] sm:$0xff] %v549_v34  }
  0xfd   :  { %525 = vst [vmem:[%s759_s3] sm:$0xff] %v524_v36   ;;  %v448_v40 = vadd.f32 %v433_v37, %v432_v35  ;;  %v606_v41 = vpop.f32.mrb[4].mxu0  ;;  %564 = vst [vmem:[%s759_s3 + $0x20] sm:$0xff] %v544_v38   ;;  %v614_v42 = vpop.f32.mrb[4].mxu1 }
  0xfe   :  { %v231_v43 = vpop.f32.mrb[5].mxu0  ;;  %v350_v44 = vadd.f32 %v614_v42, %v488_v16  ;;  %v263_v45 = vpop.f32.mrb[5].mxu1  ;;  %v342_v51 = vadd.f32 %v606_v41, %v488_v16 }
  0xff   :  { %v449_v47 = vadd.f32 %v448_v40, %v434_v39  ;;  %v340_v48 = vadd.f32 %v488_v16, %v231_v43  ;;  %v607_v49 = vpop.f32.mrb[6].mxu0  ;;  %v615_v50 = vpop.f32.mrb[6].mxu1  ;;  %v348_v59 = vadd.f32 %v488_v16, %v263_v45 }
 0x100   :  { %v343_v52 = vadd.f32 %v607_v49, %v488_v16  ;;  %v234_v53 = vpop.f32.mrb[7].mxu0  ;;  %v351_v54 = vadd.f32 %v615_v50, %v488_v16  ;;  %v266_v55 = vpop.f32.mrb[7].mxu1  ;;  %v438_v2 = vmul.f32 %v342_v51, %v342_v51  ;;  %v446_v19 = vmul.f32 %v350_v44, %v350_v44 }
 0x101   :  { %v436_v56 = vmul.f32 %v340_v48, %v340_v48  ;;  %v450_v57 = vadd.f32 %v449_v47, %v435_v46  ;;  %v341_v58 = vadd.f32 %v488_v16, %v234_v53  ;;  %v349_v1 = vadd.f32 %v488_v16, %v266_v55 }
 0x102   :  { %v539_v60 = vpack.c.bf16 %v343_v52, %v342_v51  ;;  %v559_v61 = vpack.c.bf16 %v351_v54, %v350_v44  ;;  %v439_v5 = vmul.f32 %v343_v52, %v343_v52  ;;  %v444_v15 = vmul.f32 %v348_v59, %v348_v59 }
 0x103   :  { %v451_v62 = vadd.f32 %v450_v57, %v436_v56  ;;  %v534_v63 = vpack.c.bf16 %v341_v58, %v340_v48  ;;  %v437_v0 = vmul.f32 %v341_v58, %v341_v58  ;;  %v554_v4 = vpack.c.bf16 %v349_v1, %v348_v59 }
 0x104   :  { %563 = vst [vmem:[%s759_s3 + $0x18] sm:$0xff] %v539_v60   ;;  %567 = vst [vmem:[%s759_s3 + $0x38] sm:$0xff] %v559_v61   ;;  %v445_v18 = vmul.f32 %v349_v1, %v349_v1  ;;  %v447_v22 = vmul.f32 %v351_v54, %v351_v54 }
 0x105   :  { %562 = vst [vmem:[%s759_s3 + $0x10] sm:$0xff] %v534_v63   ;;  %v452_v3 = vadd.f32 %v451_v62, %v437_v0  ;;  %566 = vst [vmem:[%s759_s3 + $0x30] sm:$0xff] %v554_v4  }
 0x107   :  { %v453_v6 = vadd.f32 %v452_v3, %v438_v2 }
 0x109   :  { %v454_v8 = vadd.f32 %v453_v6, %v439_v5 }
 0x10b   :  { %v455_v9 = vadd.f32 %v454_v8, %v440_v7 }
 0x10d   :  { %v456_v12 = vadd.f32 %v455_v9, %v441_v10 }
 0x10f   :  { %v457_v14 = vadd.f32 %v456_v12, %v442_v11 }
 0x111   :  { %v458_v16 = vadd.f32 %v457_v14, %v443_v13 }
 0x113   :  { %v459_v17 = vadd.f32 %v458_v16, %v444_v15 }
 0x115   :  { %v460_v21 = vadd.f32 %v459_v17, %v445_v18 }
 0x117   :  { %v461_v23 = vadd.f32 %v460_v21, %v446_v19 }
 0x119   :  { %v462_v24 = vadd.f32 %v461_v23, %v447_v22 }
 0x11b   :  { %463 = vst [vmem:[%s760_s4] sm:$0xff] %v462_v24 }

</bundles_post_ra>
